<compile_context>
chip_gen: v7x
topology: tpu7x:2x2x1
jax: 0.10.0
libtpu: 0.0.40
codegen_flags: <defaults>
</compile_context>

<pallas_src>
import functools

import jax
import jax.numpy as jnp
from jax.experimental import pallas as pl
from jax.experimental.pallas import tpu as pltpu


TM = 128      # node-row tile (sublane axis); 256 is better on v6e/v7x MXUs
D_PAD = 128   # lane-padded feature width (covers input_dim and hidden_dim)
O_PAD = 128   # lane-padded prediction width


# ----------------------------------------------------------------------------
# Fused Pallas kernel
# ----------------------------------------------------------------------------

def _fused_gin_net_kernel(eps_ref,                       # scalar prefetch (SMEM)
                          x_ref, a_ref, p_ref,
                          w1_ref, b1_ref, w2_ref, b2_ref,
                          wp_ref, pb_ref,
                          out_ref,
                          h_ref, pooled_ref):
    """Grid = (layer_pass, node-row-tile), both sequential ("arbitrary").

    layer_pass 0 streams x tiles into the bf16 h carry and pools hidden_rep[0];
    layer_pass l>=1 runs GIN layer l-1: A_rows @ h on the MXU, (1+eps)*self as
    a scalar FMA, the BN-folded 2-layer MLP, then accumulates pool @ h into a
    small f32 scratch.  The pooled @ wp_l projection runs once per layer at the
    last row tile, accumulating into the resident output block.
    """
    l = pl.program_id(0)                   # 0 = seed pass, 1..L = GIN layers
    i = pl.program_id(1)                   # node row-tile index
    n_tiles = pl.num_programs(1)
    tm = p_ref.shape[1]
    n_pad = a_ref.shape[1]
    d = w1_ref.shape[1]

    row0 = pl.multiple_of(i * tm, tm)

    # ---- one-time init: start the output accumulator at the prediction bias.
    @pl.when(jnp.logical_and(l == 0, i == 0))
    def _():
        out_ref[...] = jnp.zeros_like(out_ref) + pb_ref[...]

    # ---- per-layer init: clear the pooled accumulator.
    @pl.when(i == 0)
    def _():
        pooled_ref[...] = jnp.zeros_like(pooled_ref)

    # ---- seed pass (l == 0): stream x tile into the h carry + pool it.
    @pl.when(l == 0)
    def _():
        x_tile = x_ref[...]                                   # (TM, d) bf16
        h_ref[pl.ds(row0, tm), :] = x_tile                    # buffer 0
        pooled_ref[...] += jnp.dot(p_ref[...], x_tile,
                                   preferred_element_type=jnp.float32)

    # ---- GIN layer (l - 1) for one row stripe of A.
    @pl.when(l > 0)
    def _():
        off_in = pl.multiple_of(((l - 1) % 2) * n_pad, tm)    # ping (input)
        off_out = pl.multiple_of((l % 2) * n_pad, tm)         # pong (output)

        h_full = h_ref[pl.ds(off_in, n_pad), :]               # (n_pad, d) bf16
        h_rows = h_ref[pl.ds(pl.multiple_of(off_in + row0, tm), tm), :]

        a_rows = a_ref[...].astype(jnp.float32).astype(jnp.bfloat16)
        agg = jnp.dot(a_rows, h_full, preferred_element_type=jnp.float32)
        eps1p = eps_ref[jnp.maximum(l - 1, 0)]                # scalar (1+eps)
        agg = agg + eps1p * h_rows.astype(jnp.float32)

        # 2-layer MLP (Linear->BN->ReLU->Linear) then outer BN->ReLU; the
        # eval-mode BatchNorms are pre-folded into w1/b1 and w2/b2.
        z = jnp.dot(agg.astype(jnp.bfloat16), w1_ref[...],
                    preferred_element_type=jnp.float32) + b1_ref[...]
        z = jnp.maximum(z, 0.0)
        z = jnp.dot(z.astype(jnp.bfloat16), w2_ref[...],
                    preferred_element_type=jnp.float32) + b2_ref[...]
        h_new = jnp.maximum(z, 0.0).astype(jnp.bfloat16)      # dropout = id (eval)

        h_ref[pl.ds(pl.multiple_of(off_out + row0, tm), tm), :] = h_new
        pooled_ref[...] += jnp.dot(p_ref[...], h_new,
                                   preferred_element_type=jnp.float32)

    # ---- hoisted global_add_pool + prediction-Linear (once per layer pass).
    @pl.when(i == n_tiles - 1)
    def _():
        wp_l = wp_ref[pl.ds(pl.multiple_of(l * d, d), d), :]
        out_ref[...] += jnp.dot(pooled_ref[...].astype(jnp.bfloat16), wp_l,
                                preferred_element_type=jnp.float32)


# ----------------------------------------------------------------------------
# Glue: densify graph structure (padded)
# ----------------------------------------------------------------------------

def _densify(x, edge_index, batch, num_graphs):
    n, input_dim = x.shape
    n_pad = int(pl.cdiv(n, TM)) * TM
    g_pad = max(16, int(pl.cdiv(num_graphs, 16)) * 16)

    x_pad = (jnp.zeros((n_pad, D_PAD), jnp.float32)
             .at[:n, :input_dim].set(x)).astype(jnp.bfloat16)

    src, dst = edge_index[0], edge_index[1]
    # A[dst, src] = edge multiplicity.  int8 is exact for counts <= 127.
    # TODO(synk): guard/assert max edge multiplicity <= 127 for real datasets.
    adj = jnp.zeros((n_pad, n_pad), jnp.int32).at[dst, src].add(1)
    adj = adj.astype(jnp.int8)

    batch_pad = jnp.full((n_pad,), -1, jnp.int32).at[:n].set(
        batch.astype(jnp.int32))
    pool = (batch_pad[None, :] ==
            jnp.arange(g_pad, dtype=jnp.int32)[:, None]).astype(jnp.bfloat16)
    return x_pad, adj, pool, n_pad, g_pad


def _estimate_vmem_bytes(n_pad, g_pad, num_blocks):
    d, o, tm = D_PAD, O_PAD, TM
    h_carry = 2 * n_pad * d * 2                 # bf16 ping-pong carry
    pooled = g_pad * d * 4                      # f32 pooled scratch
    a_strip = 2 * tm * n_pad * 1                # int8 A stripe, double-buffered
    x_tile = 2 * tm * d * 2                     # bf16 x tile, double-buffered
    pool_cols = 2 * g_pad * tm * 2              # bf16 pool columns
    weights = 2 * (2 * d * d * 2 + 2 * 1 * d * 4)
    wp = num_blocks * d * o * 2                 # resident prediction weight
    misc = 2 * g_pad * o * 4 + 2 * o * 4        # out accumulator + bias
    return h_carry + pooled + a_strip + x_tile + pool_cols + weights + wp + misc


# ----------------------------------------------------------------------------
# Net forward (single fused pallas_call)
# ----------------------------------------------------------------------------

def net_forward(kparams, x, edge_index, batch, *, num_graphs, output_dim):
    x_pad, adj, pool, n_pad, g_pad = _densify(x, edge_index, batch, num_graphs)
    num_gin_layers = kparams["w1"].shape[0]
    d, o = D_PAD, O_PAD
    n_tiles = n_pad // TM
    grid = (num_gin_layers + 1, n_tiles)        # pass 0 = seed, 1..L = GIN

    need = _estimate_vmem_bytes(n_pad, g_pad, num_gin_layers + 1)
    vmem_limit = int(min(max(3 * need, 16 << 20), 64 << 20))

    wl = lambda l, i, eps: (jnp.maximum(l - 1, 0), 0, 0)      # per-layer weights

    out_pad = pl.pallas_call(
        _fused_gin_net_kernel,
        out_shape=jax.ShapeDtypeStruct((g_pad, o), jnp.float32),
        grid_spec=pltpu.PrefetchScalarGridSpec(
            num_scalar_prefetch=1,              # (1 + eps_l) table in SMEM
            grid=grid,
            in_specs=[
                # x row tile: only streamed during the seed pass (l == 0).
                pl.BlockSpec((TM, d),
                             lambda l, i, eps: (jnp.where(l == 0, i, 0), 0)),
                # A row stripe (int8): only streamed during GIN passes.
                pl.BlockSpec((TM, n_pad),
                             lambda l, i, eps: (jnp.where(l == 0, 0, i), 0)),
                # pool columns for this row tile.
                pl.BlockSpec((g_pad, TM), lambda l, i, eps: (0, i)),
                pl.BlockSpec((None, d, d), wl),               # W1 (BN folded)
                pl.BlockSpec((None, 1, d), wl),               # b1
                pl.BlockSpec((None, d, d), wl),               # W2 (BN folded)
                pl.BlockSpec((None, 1, d), wl),               # b2
                pl.BlockSpec(((num_gin_layers + 1) * d, o),
                             lambda l, i, eps: (0, 0)),       # pred W (resident)
                pl.BlockSpec((1, o), lambda l, i, eps: (0, 0)),   # pred bias
            ],
            out_specs=pl.BlockSpec((g_pad, o), lambda l, i, eps: (0, 0)),
            scratch_shapes=[
                pltpu.VMEM((2 * n_pad, d), jnp.bfloat16),     # h ping-pong carry
                pltpu.VMEM((g_pad, d), jnp.float32),          # pooled accumulator
            ],
        ),
        compiler_params=pltpu.CompilerParams(
            # Both axes carry state (h carry, pooled/out accumulators), so they
            # must remain sequential.
            dimension_semantics=("arbitrary", "arbitrary"),
            vmem_limit_bytes=vmem_limit),
    )(kparams["eps1p"], x_pad, adj, pool, kparams["w1"], kparams["b1"],
      kparams["w2"], kparams["b2"], kparams["wp"], kparams["pb"])

    return out_pad[:num_graphs, :output_dim]


# ----------------------------------------------------------------------------
# Parameters: torch-like init, then fold/pad/stack for the kernel
# ----------------------------------------------------------------------------

def xavier_uniform(key, fan_in, fan_out):
    a = jnp.sqrt(6.0 / (fan_in + fan_out))
    # Stored as [in, out] (transposed vs. PyTorch's [out, in]) so that x @ W.
    return jax.random.uniform(key, (fan_in, fan_out), jnp.float32, -a, a)


def init_net_params(key, num_layers, num_mlp_layers, input_dim, hidden_dim,
                    output_dim):
    """Deterministic parameters matching the module __init__ (eval mode)."""
    assert num_mlp_layers == 2, "this script implements the 2-layer GIN MLP"
    assert num_layers >= 2
    ones = lambda: jnp.ones((hidden_dim,), jnp.float32)
    zeros = lambda: jnp.zeros((hidden_dim,), jnp.float32)
    params = {"gin": [], "out_bn": [], "eps": []}
    for layer in range(num_layers - 1):
        din = input_dim if layer == 0 else hidden_dim
        key, k1, k2 = jax.random.split(key, 3)
        w1 = xavier_uniform(k1, din, hidden_dim)
        w2 = xavier_uniform(k2, hidden_dim, hidden_dim)
        # (w1, b1, bn1 gamma, beta, running_mean, running_var, w2, b2)
        params["gin"].append((w1, zeros(), ones(), zeros(), zeros(), ones(),
                              w2, zeros()))
        # outer BatchNorm1d (eval running stats): gamma, beta, mean, var
        params["out_bn"].append((ones(), zeros(), zeros(), ones()))
        # eps initializes to 0 whether or not learn_eps is set
        params["eps"].append(jnp.zeros((), jnp.float32))
    key, kf = jax.random.split(key)
    pred_in = input_dim + (num_layers - 1) * hidden_dim
    params["pred_w"] = xavier_uniform(kf, pred_in, output_dim)
    params["pred_b"] = jnp.zeros((output_dim,), jnp.float32)
    return params


def pack_params_for_kernel(params, input_dim, hidden_dim, output_dim,
                           bn_eps=1e-5):
    """Fold eval-mode BatchNorms into the Linears, pad to lane-dense slabs,
    stack per-layer tensors so a single fused kernel can index them by layer."""
    d, o = D_PAD, O_PAD
    num_gin_layers = len(params["gin"])
    w1s, b1s, w2s, b2s = [], [], [], []
    for layer in range(num_gin_layers):
        w1, b1, g1, be1, m1, v1, w2, b2 = params["gin"][layer]
        go, beo, mo, vo = params["out_bn"][layer]
        # BN(y) = (y - mean)/sqrt(var+eps)*gamma + beta  ->  y*s + t
        s1 = g1 / jnp.sqrt(v1 + bn_eps)
        t1 = be1 - m1 * s1
        w1f, b1f = w1 * s1[None, :], b1 * s1 + t1
        so = go / jnp.sqrt(vo + bn_eps)
        to = beo - mo * so
        w2f, b2f = w2 * so[None, :], b2 * so + to
        din = w1.shape[0]
        w1s.append(jnp.zeros((d, d), jnp.float32).at[:din, :hidden_dim].set(w1f))
        b1s.append(jnp.zeros((1, d), jnp.float32).at[0, :hidden_dim].set(b1f))
        w2s.append(jnp.zeros((d, d), jnp.float32)
                   .at[:hidden_dim, :hidden_dim].set(w2f))
        b2s.append(jnp.zeros((1, d), jnp.float32).at[0, :hidden_dim].set(b2f))

    # Prediction Linear, split per hidden_rep block ([x | h_1 | ... | h_L]) and
    # lane-padded so each block is a (D_PAD, O_PAD) slab.
    wp = params["pred_w"]
    blocks = [jnp.zeros((d, o), jnp.float32)
              .at[:input_dim, :output_dim].set(wp[:input_dim])]
    for k in range(num_gin_layers):
        r0 = input_dim + k * hidden_dim
        blocks.append(jnp.zeros((d, o), jnp.float32)
                      .at[:hidden_dim, :output_dim].set(wp[r0:r0 + hidden_dim]))
    pb = jnp.zeros((1, o), jnp.float32).at[0, :output_dim].set(params["pred_b"])

    return {
        "w1": jnp.stack(w1s).astype(jnp.bfloat16),    # [L, D, D]
        "b1": jnp.stack(b1s),                         # [L, 1, D] f32
        "w2": jnp.stack(w2s).astype(jnp.bfloat16),    # [L, D, D]
        "b2": jnp.stack(b2s),                         # [L, 1, D] f32
        "eps1p": jnp.stack(params["eps"]) + 1.0,      # [L] f32, holds (1+eps)
        "wp": jnp.concatenate(blocks, axis=0).astype(jnp.bfloat16),  # [(L+1)D, O]
        "pb": pb,                                     # [1, O] f32
    }


# ----------------------------------------------------------------------------
# Pure-JAX reference (mirrors the kernel's cast points) for a sanity check
# ----------------------------------------------------------------------------

def reference_forward(kparams, x, edge_index, batch, *, num_graphs, output_dim):
    x_pad, adj, pool, _, _ = _densify(x, edge_index, batch, num_graphs)
    d = D_PAD
    num_gin_layers = kparams["w1"].shape[0]
    adj_bf = adj.astype(jnp.float32).astype(jnp.bfloat16)
    h = x_pad                                              # bf16
    pooled = jnp.dot(pool, h, preferred_element_type=jnp.float32)
    out = kparams["pb"] + jnp.dot(pooled.astype(jnp.bfloat16), kparams["wp"][:d],
                                  preferred_element_type=jnp.float32)
    for l in range(num_gin_layers):
        agg = jnp.dot(adj_bf, h, preferred_element_type=jnp.float32)
        agg = agg + kparams["eps1p"][l] * h.astype(jnp.float32)
        z = jnp.dot(agg.astype(jnp.bfloat16), kparams["w1"][l],
                    preferred_element_type=jnp.float32) + kparams["b1"][l]
        z = jnp.maximum(z, 0.0)
        z = jnp.dot(z.astype(jnp.bfloat16), kparams["w2"][l],
                    preferred_element_type=jnp.float32) + kparams["b2"][l]
        h = jnp.maximum(z, 0.0).astype(jnp.bfloat16)
        pooled = jnp.dot(pool, h, preferred_element_type=jnp.float32)
        out = out + jnp.dot(pooled.astype(jnp.bfloat16),
                            kparams["wp"][(l + 1) * d:(l + 2) * d],
                            preferred_element_type=jnp.float32)
    return out[:num_graphs, :output_dim]


# ----------------------------------------------------------------------------
# Demo
# ----------------------------------------------------------------------------

if __name__ == "__main__":
    num_layers = 3       # -> 2 GIN layers
    num_mlp_layers = 2
    input_dim = 8
    hidden_dim = 32
    output_dim = 4
    final_dropout = 0.5  # eval mode -> dropout is identity
    learn_eps = True     # eps starts at 0 either way

    n_nodes, n_edges, num_graphs = 16, 40, 2

    key = jax.random.PRNGKey(0)
    key, kx, ke, kp_key = jax.random.split(key, 4)
    x = jax.random.normal(kx, (n_nodes, input_dim), jnp.float32)
    edge_index = jax.random.randint(ke, (2, n_edges), 0, n_nodes, jnp.int32)
    batch = jnp.concatenate([
        jnp.zeros((n_nodes // 2,), jnp.int32),
        jnp.ones((n_nodes - n_nodes // 2,), jnp.int32),
    ])

    params = init_net_params(kp_key, num_layers, num_mlp_layers,
                             input_dim, hidden_dim, output_dim)
    kparams = pack_params_for_kernel(params, input_dim, hidden_dim, output_dim)

    fwd = jax.jit(functools.partial(net_forward, num_graphs=num_graphs,
                                    output_dim=output_dim))
    out = jax.block_until_ready(fwd(kparams, x, edge_index, batch))

    ref = jax.block_until_ready(
        reference_forward(kparams, x, edge_index, batch,
                          num_graphs=num_graphs, output_dim=output_dim))

    assert out.shape == (num_graphs, output_dim)
    assert bool(jnp.all(jnp.isfinite(out)))
    assert bool(jnp.allclose(out, ref, atol=5e-2, rtol=5e-2))
    print("KERNEL_OK")
</pallas_src>

<mosaic_0001>
module attributes {stable_mosaic.version = 11 : i64} {
  func.func @_fused_gin_net_kernel(%arg0: i32, %arg1: i32, %arg2: memref<2xf32, #tpu.memory_space<smem>>, %arg3: memref<128x128xbf16, #tpu.memory_space<vmem>>, %arg4: memref<128x128xi8, #tpu.memory_space<vmem>>, %arg5: memref<16x128xbf16, #tpu.memory_space<vmem>>, %arg6: memref<1x128x128xbf16, #tpu.memory_space<vmem>>, %arg7: memref<1x1x128xf32, #tpu.memory_space<vmem>>, %arg8: memref<1x128x128xbf16, #tpu.memory_space<vmem>>, %arg9: memref<1x1x128xf32, #tpu.memory_space<vmem>>, %arg10: memref<384x128xbf16, #tpu.memory_space<vmem>>, %arg11: memref<1x128xf32, #tpu.memory_space<vmem>>, %arg12: memref<16x128xf32, #tpu.memory_space<vmem>>, %arg13: memref<256x128xbf16, #tpu.memory_space<vmem>>, %arg14: memref<16x128xf32, #tpu.memory_space<vmem>>) attributes {dimension_semantics = [#tpu.dimension_semantics<arbitrary>, #tpu.dimension_semantics<arbitrary>], iteration_bounds = array<i64: 3, 1>, scalar_prefetch = 1 : i64, scratch_operands = 2 : i64, tpu.core_type = #tpu.core_type<tc>, window_params = [{transform_indices = @transform_0, window_bounds = array<i64: 128, 128>}, {transform_indices = @transform_1, window_bounds = array<i64: 128, 128>}, {transform_indices = @transform_2, window_bounds = array<i64: 16, 128>}, {transform_indices = @transform_3, window_bounds = array<i64: 1, 128, 128>}, {transform_indices = @transform_4, window_bounds = array<i64: 1, 1, 128>}, {transform_indices = @transform_5, window_bounds = array<i64: 1, 128, 128>}, {transform_indices = @transform_6, window_bounds = array<i64: 1, 1, 128>}, {pipeline_mode = #tpu.pipeline_mode<synchronous>, transform_indices = @transform_7, window_bounds = array<i64: 384, 128>}, {pipeline_mode = #tpu.pipeline_mode<synchronous>, transform_indices = @transform_8, window_bounds = array<i64: 1, 128>}, {pipeline_mode = #tpu.pipeline_mode<synchronous>, transform_indices = @transform_9, window_bounds = array<i64: 16, 128>}]} {
    %c128_i32 = arith.constant 128 : i32
    %0 = arith.muli %arg1, %c128_i32 : i32
    %1 = tpu.assume_multiple %0, 128 : i32
    %c0_i32 = arith.constant 0 : i32
    %2 = arith.cmpi eq, %arg0, %c0_i32 : i32
    %c0_i32_0 = arith.constant 0 : i32
    %3 = arith.cmpi eq, %arg1, %c0_i32_0 : i32
    %4 = arith.andi %2, %3 : i1
    %5 = arith.extui %4 : i1 to i32
    %c0_i32_1 = arith.constant 0 : i32
    %6 = arith.cmpi ne, %5, %c0_i32_1 : i32
    scf.if %6 {
      %cst = arith.constant 0.000000e+00 : f32
      %19 = vector.broadcast %cst : f32 to vector<16x128xf32>
      %c0 = arith.constant 0 : index
      %c0_10 = arith.constant 0 : index
      %20 = vector.load %arg11[%c0, %c0_10] : memref<1x128xf32, #tpu.memory_space<vmem>>, vector<1x128xf32>
      %21 = vector.broadcast %20 : vector<1x128xf32> to vector<16x128xf32>
      %22 = arith.addf %19, %21 : vector<16x128xf32>
      %c0_11 = arith.constant 0 : index
      %c0_12 = arith.constant 0 : index
      %23 = vector.load %arg12[%c0_11, %c0_12] : memref<16x128xf32, #tpu.memory_space<vmem>>, vector<16x128xf32>
      tpu.vector_store %arg12[%c0_11, %c0_12], %22 {strides = array<i32>} : memref<16x128xf32, #tpu.memory_space<vmem>>, vector<16x128xf32>,
    } else {
    }
    %c0_i32_2 = arith.constant 0 : i32
    %7 = arith.cmpi eq, %arg1, %c0_i32_2 : i32
    %8 = arith.extui %7 : i1 to i32
    %c0_i32_3 = arith.constant 0 : i32
    %9 = arith.cmpi ne, %8, %c0_i32_3 : i32
    scf.if %9 {
      %cst = arith.constant 0.000000e+00 : f32
      %19 = vector.broadcast %cst : f32 to vector<16x128xf32>
      %c0 = arith.constant 0 : index
      %c0_10 = arith.constant 0 : index
      %20 = vector.load %arg14[%c0, %c0_10] : memref<16x128xf32, #tpu.memory_space<vmem>>, vector<16x128xf32>
      tpu.vector_store %arg14[%c0, %c0_10], %19 {strides = array<i32>} : memref<16x128xf32, #tpu.memory_space<vmem>>, vector<16x128xf32>,
    } else {
    }
    %c0_i32_4 = arith.constant 0 : i32
    %10 = arith.cmpi eq, %arg0, %c0_i32_4 : i32
    %11 = arith.extui %10 : i1 to i32
    %c0_i32_5 = arith.constant 0 : i32
    %12 = arith.cmpi ne, %11, %c0_i32_5 : i32
    scf.if %12 {
      %c0 = arith.constant 0 : index
      %c0_10 = arith.constant 0 : index
      %19 = vector.load %arg3[%c0, %c0_10] : memref<128x128xbf16, #tpu.memory_space<vmem>>, vector<128x128xbf16>
      %20 = arith.index_cast %1 : i32 to index
      %c0_11 = arith.constant 0 : index
      %21 = vector.load %arg13[%20, %c0_11] : memref<256x128xbf16, #tpu.memory_space<vmem>>, vector<128x128xbf16>
      tpu.vector_store %arg13[%20, %c0_11], %19 {strides = array<i32>} : memref<256x128xbf16, #tpu.memory_space<vmem>>, vector<128x128xbf16>,
      %c0_12 = arith.constant 0 : index
      %c0_13 = arith.constant 0 : index
      %22 = vector.load %arg14[%c0_12, %c0_13] : memref<16x128xf32, #tpu.memory_space<vmem>>, vector<16x128xf32>
      %c0_14 = arith.constant 0 : index
      %c0_15 = arith.constant 0 : index
      %23 = vector.load %arg5[%c0_14, %c0_15] : memref<16x128xbf16, #tpu.memory_space<vmem>>, vector<16x128xbf16>
      %cst = arith.constant dense<0.000000e+00> : vector<16x128xf32>
      %24 = tpu.matmul %23, %19, %cst {dimension_numbers = #tpu.dot_dimension_numbers<[1], [0], [0], [1], [0, 0, 1, 1], [], []>} : vector<16x128xbf16>, vector<128x128xbf16>, vector<16x128xf32> -> vector<16x128xf32>
      %25 = arith.addf %22, %24 : vector<16x128xf32>
      %c0_16 = arith.constant 0 : index
      %c0_17 = arith.constant 0 : index
      %26 = vector.load %arg14[%c0_16, %c0_17] : memref<16x128xf32, #tpu.memory_space<vmem>>, vector<16x128xf32>
      tpu.vector_store %arg14[%c0_16, %c0_17], %25 {strides = array<i32>} : memref<16x128xf32, #tpu.memory_space<vmem>>, vector<16x128xf32>,
    } else {
    }
    %c0_i32_6 = arith.constant 0 : i32
    %13 = arith.cmpi sgt, %arg0, %c0_i32_6 : i32
    %14 = arith.extui %13 : i1 to i32
    %c0_i32_7 = arith.constant 0 : i32
    %15 = arith.cmpi ne, %14, %c0_i32_7 : i32
    scf.if %15 {
      %c1_i32 = arith.constant 1 : i32
      %19 = arith.subi %arg0, %c1_i32 : i32
      %c2_i32 = arith.constant 2 : i32
      %c0_i32_10 = arith.constant 0 : i32
      %20 = arith.cmpi eq, %c2_i32, %c0_i32_10 : i32
      %c1_i32_11 = arith.constant 1 : i32
      %21 = arith.select %20, %c1_i32_11, %c2_i32 : i32
      %22 = arith.remsi %19, %21 : i32
      %c0_i32_12 = arith.constant 0 : i32
      %23 = arith.cmpi ne, %22, %c0_i32_12 : i32
      %c0_i32_13 = arith.constant 0 : i32
      %24 = arith.cmpi slt, %22, %c0_i32_13 : i32
      %c0_i32_14 = arith.constant 0 : i32
      %25 = arith.cmpi slt, %21, %c0_i32_14 : i32
      %26 = arith.xori %24, %25 : i1
      %27 = arith.andi %26, %23 : i1
      %28 = arith.addi %22, %21 : i32
      %29 = arith.select %27, %28, %22 : i32
      %c128_i32_15 = arith.constant 128 : i32
      %30 = arith.muli %29, %c128_i32_15 : i32
      %31 = tpu.assume_multiple %30, 128 : i32
      %c2_i32_16 = arith.constant 2 : i32
      %c0_i32_17 = arith.constant 0 : i32
      %32 = arith.cmpi eq, %c2_i32_16, %c0_i32_17 : i32
      %c1_i32_18 = arith.constant 1 : i32
      %33 = arith.select %32, %c1_i32_18, %c2_i32_16 : i32
      %34 = arith.remsi %arg0, %33 : i32
      %c0_i32_19 = arith.constant 0 : i32
      %35 = arith.cmpi ne, %34, %c0_i32_19 : i32
      %c0_i32_20 = arith.constant 0 : i32
      %36 = arith.cmpi slt, %34, %c0_i32_20 : i32
      %c0_i32_21 = arith.constant 0 : i32
      %37 = arith.cmpi slt, %33, %c0_i32_21 : i32
      %38 = arith.xori %36, %37 : i1
      %39 = arith.andi %38, %35 : i1
      %40 = arith.addi %34, %33 : i32
      %41 = arith.select %39, %40, %34 : i32
      %c128_i32_22 = arith.constant 128 : i32
      %42 = arith.muli %41, %c128_i32_22 : i32
      %43 = tpu.assume_multiple %42, 128 : i32
      %44 = arith.index_cast %31 : i32 to index
      %c0 = arith.constant 0 : index
      %45 = vector.load %arg13[%44, %c0] : memref<256x128xbf16, #tpu.memory_space<vmem>>, vector<128x128xbf16>
      %46 = arith.addi %31, %1 : i32
      %47 = tpu.assume_multiple %46, 128 : i32
      %48 = arith.index_cast %47 : i32 to index
      %c0_23 = arith.constant 0 : index
      %49 = vector.load %arg13[%48, %c0_23] : memref<256x128xbf16, #tpu.memory_space<vmem>>, vector<128x128xbf16>
      %c0_24 = arith.constant 0 : index
      %c0_25 = arith.constant 0 : index
      %50 = vector.load %arg4[%c0_24, %c0_25] : memref<128x128xi8, #tpu.memory_space<vmem>>, vector<128x128xi8>
      %51 = arith.sitofp %50 : vector<128x128xi8> to vector<128x128xf32>
      %52 = arith.truncf %51 : vector<128x128xf32> to vector<128x128xbf16>
      %cst = arith.constant dense<0.000000e+00> : vector<128x128xf32>
      %53 = tpu.matmul %52, %45, %cst {dimension_numbers = #tpu.dot_dimension_numbers<[1], [0], [0], [1], [0, 0, 1, 1], [], []>} : vector<128x128xbf16>, vector<128x128xbf16>, vector<128x128xf32> -> vector<128x128xf32>
      %c1_i32_26 = arith.constant 1 : i32
      %54 = arith.subi %arg0, %c1_i32_26 : i32
      %c0_i32_27 = arith.constant 0 : i32
      %55 = arith.maxsi %54, %c0_i32_27 : i32
      %56 = arith.index_cast %55 : i32 to index
      %57 = memref.load %arg2[%56] : memref<2xf32, #tpu.memory_space<smem>>
      %58 = arith.extf %49 : vector<128x128xbf16> to vector<128x128xf32>
      %59 = vector.broadcast %57 : f32 to vector<128x128xf32>
      %60 = arith.mulf %59, %58 : vector<128x128xf32>
      %61 = arith.addf %53, %60 : vector<128x128xf32>
      %62 = arith.truncf %61 : vector<128x128xf32> to vector<128x128xbf16>
      %c0_28 = arith.constant 0 : index
      %c0_29 = arith.constant 0 : index
      %c0_30 = arith.constant 0 : index
      %63 = vector.load %arg6[%c0_28, %c0_29, %c0_30] : memref<1x128x128xbf16, #tpu.memory_space<vmem>>, vector<1x128x128xbf16>
      %64 = vector.shape_cast %63 : vector<1x128x128xbf16> to vector<128x128xbf16>
      %cst_31 = arith.constant dense<0.000000e+00> : vector<128x128xf32>
      %65 = tpu.matmul %62, %64, %cst_31 {dimension_numbers = #tpu.dot_dimension_numbers<[1], [0], [0], [1], [0, 0, 1, 1], [], []>} : vector<128x128xbf16>, vector<128x128xbf16>, vector<128x128xf32> -> vector<128x128xf32>
      %c0_32 = arith.constant 0 : index
      %c0_33 = arith.constant 0 : index
      %c0_34 = arith.constant 0 : index
      %66 = vector.load %arg7[%c0_32, %c0_33, %c0_34] : memref<1x1x128xf32, #tpu.memory_space<vmem>>, vector<1x1x128xf32>
      %67 = vector.shape_cast %66 : vector<1x1x128xf32> to vector<1x128xf32>
      %68 = vector.broadcast %67 : vector<1x128xf32> to vector<128x128xf32>
      %69 = arith.addf %65, %68 : vector<128x128xf32>
      %cst_35 = arith.constant 0.000000e+00 : f32
      %70 = vector.broadcast %cst_35 : f32 to vector<128x128xf32>
      %71 = arith.maximumf %69, %70 : vector<128x128xf32>
      %72 = arith.truncf %71 : vector<128x128xf32> to vector<128x128xbf16>
      %c0_36 = arith.constant 0 : index
      %c0_37 = arith.constant 0 : index
      %c0_38 = arith.constant 0 : index
      %73 = vector.load %arg8[%c0_36, %c0_37, %c0_38] : memref<1x128x128xbf16, #tpu.memory_space<vmem>>, vector<1x128x128xbf16>
      %74 = vector.shape_cast %73 : vector<1x128x128xbf16> to vector<128x128xbf16>
      %cst_39 = arith.constant dense<0.000000e+00> : vector<128x128xf32>
      %75 = tpu.matmul %72, %74, %cst_39 {dimension_numbers = #tpu.dot_dimension_numbers<[1], [0], [0], [1], [0, 0, 1, 1], [], []>} : vector<128x128xbf16>, vector<128x128xbf16>, vector<128x128xf32> -> vector<128x128xf32>
      %c0_40 = arith.constant 0 : index
      %c0_41 = arith.constant 0 : index
      %c0_42 = arith.constant 0 : index
      %76 = vector.load %arg9[%c0_40, %c0_41, %c0_42] : memref<1x1x128xf32, #tpu.memory_space<vmem>>, vector<1x1x128xf32>
      %77 = vector.shape_cast %76 : vector<1x1x128xf32> to vector<1x128xf32>
      %78 = vector.broadcast %77 : vector<1x128xf32> to vector<128x128xf32>
      %79 = arith.addf %75, %78 : vector<128x128xf32>
      %cst_43 = arith.constant 0.000000e+00 : f32
      %80 = vector.broadcast %cst_43 : f32 to vector<128x128xf32>
      %81 = arith.maximumf %79, %80 : vector<128x128xf32>
      %82 = arith.truncf %81 : vector<128x128xf32> to vector<128x128xbf16>
      %83 = arith.addi %43, %1 : i32
      %84 = tpu.assume_multiple %83, 128 : i32
      %85 = arith.index_cast %84 : i32 to index
      %c0_44 = arith.constant 0 : index
      %86 = vector.load %arg13[%85, %c0_44] : memref<256x128xbf16, #tpu.memory_space<vmem>>, vector<128x128xbf16>
      tpu.vector_store %arg13[%85, %c0_44], %82 {strides = array<i32>} : memref<256x128xbf16, #tpu.memory_space<vmem>>, vector<128x128xbf16>,
      %c0_45 = arith.constant 0 : index
      %c0_46 = arith.constant 0 : index
      %87 = vector.load %arg14[%c0_45, %c0_46] : memref<16x128xf32, #tpu.memory_space<vmem>>, vector<16x128xf32>
      %c0_47 = arith.constant 0 : index
      %c0_48 = arith.constant 0 : index
      %88 = vector.load %arg5[%c0_47, %c0_48] : memref<16x128xbf16, #tpu.memory_space<vmem>>, vector<16x128xbf16>
      %cst_49 = arith.constant dense<0.000000e+00> : vector<16x128xf32>
      %89 = tpu.matmul %88, %82, %cst_49 {dimension_numbers = #tpu.dot_dimension_numbers<[1], [0], [0], [1], [0, 0, 1, 1], [], []>} : vector<16x128xbf16>, vector<128x128xbf16>, vector<16x128xf32> -> vector<16x128xf32>
      %90 = arith.addf %87, %89 : vector<16x128xf32>
      %c0_50 = arith.constant 0 : index
      %c0_51 = arith.constant 0 : index
      %91 = vector.load %arg14[%c0_50, %c0_51] : memref<16x128xf32, #tpu.memory_space<vmem>>, vector<16x128xf32>
      tpu.vector_store %arg14[%c0_50, %c0_51], %90 {strides = array<i32>} : memref<16x128xf32, #tpu.memory_space<vmem>>, vector<16x128xf32>,
    } else {
    }
    %c0_i32_8 = arith.constant 0 : i32
    %16 = arith.cmpi eq, %arg1, %c0_i32_8 : i32
    %17 = arith.extui %16 : i1 to i32
    %c0_i32_9 = arith.constant 0 : i32
    %18 = arith.cmpi ne, %17, %c0_i32_9 : i32
    scf.if %18 {
      %c128_i32_10 = arith.constant 128 : i32
      %19 = arith.muli %arg0, %c128_i32_10 : i32
      %20 = tpu.assume_multiple %19, 128 : i32
      %21 = arith.index_cast %20 : i32 to index
      %c0 = arith.constant 0 : index
      %22 = vector.load %arg10[%21, %c0] : memref<384x128xbf16, #tpu.memory_space<vmem>>, vector<128x128xbf16>
      %c0_11 = arith.constant 0 : index
      %c0_12 = arith.constant 0 : index
      %23 = vector.load %arg12[%c0_11, %c0_12] : memref<16x128xf32, #tpu.memory_space<vmem>>, vector<16x128xf32>
      %c0_13 = arith.constant 0 : index
      %c0_14 = arith.constant 0 : index
      %24 = vector.load %arg14[%c0_13, %c0_14] : memref<16x128xf32, #tpu.memory_space<vmem>>, vector<16x128xf32>
      %25 = arith.truncf %24 : vector<16x128xf32> to vector<16x128xbf16>
      %cst = arith.constant dense<0.000000e+00> : vector<16x128xf32>
      %26 = tpu.matmul %25, %22, %cst {dimension_numbers = #tpu.dot_dimension_numbers<[1], [0], [0], [1], [0, 0, 1, 1], [], []>} : vector<16x128xbf16>, vector<128x128xbf16>, vector<16x128xf32> -> vector<16x128xf32>
      %27 = arith.addf %23, %26 : vector<16x128xf32>
      %c0_15 = arith.constant 0 : index
      %c0_16 = arith.constant 0 : index
      %28 = vector.load %arg12[%c0_15, %c0_16] : memref<16x128xf32, #tpu.memory_space<vmem>>, vector<16x128xf32>
      tpu.vector_store %arg12[%c0_15, %c0_16], %27 {strides = array<i32>} : memref<16x128xf32, #tpu.memory_space<vmem>>, vector<16x128xf32>,
    } else {
    }
    return
  }
  func.func @transform_0(%arg0: i32, %arg1: i32, %arg2: memref<2xf32, #tpu.memory_space<smem>>) -> (i32, i32) {
    %c0_i32 = arith.constant 0 : i32
    %0 = arith.cmpi eq, %arg0, %c0_i32 : i32
    %c0_i32_0 = arith.constant 0 : i32
    %1 = arith.select %0, %arg1, %c0_i32_0 : i32
    %c0_i32_1 = arith.constant 0 : i32
    %c0_i32_2 = arith.constant 0 : i32
    return %1, %c0_i32_1 : i32, i32
  }
  func.func @transform_1(%arg0: i32, %arg1: i32, %arg2: memref<2xf32, #tpu.memory_space<smem>>) -> (i32, i32) {
    %c0_i32 = arith.constant 0 : i32
    %0 = arith.cmpi eq, %arg0, %c0_i32 : i32
    %c0_i32_0 = arith.constant 0 : i32
    %1 = arith.select %0, %c0_i32_0, %arg1 : i32
    %c0_i32_1 = arith.constant 0 : i32
    %c0_i32_2 = arith.constant 0 : i32
    return %1, %c0_i32_1 : i32, i32
  }
  func.func @transform_2(%arg0: i32, %arg1: i32, %arg2: memref<2xf32, #tpu.memory_space<smem>>) -> (i32, i32) {
    %c0_i32 = arith.constant 0 : i32
    %c0_i32_0 = arith.constant 0 : i32
    return %c0_i32, %arg1 : i32, i32
  }
  func.func @transform_3(%arg0: i32, %arg1: i32, %arg2: memref<2xf32, #tpu.memory_space<smem>>) -> (i32, i32, i32) {
    %c1_i32 = arith.constant 1 : i32
    %0 = arith.subi %arg0, %c1_i32 : i32
    %c0_i32 = arith.constant 0 : i32
    %1 = arith.maxsi %0, %c0_i32 : i32
    %c0_i32_0 = arith.constant 0 : i32
    %c0_i32_1 = arith.constant 0 : i32
    %c0_i32_2 = arith.constant 0 : i32
    return %1, %c0_i32_0, %c0_i32_1 : i32, i32, i32
  }
  func.func @transform_4(%arg0: i32, %arg1: i32, %arg2: memref<2xf32, #tpu.memory_space<smem>>) -> (i32, i32, i32) {
    %c1_i32 = arith.constant 1 : i32
    %0 = arith.subi %arg0, %c1_i32 : i32
    %c0_i32 = arith.constant 0 : i32
    %1 = arith.maxsi %0, %c0_i32 : i32
    %c0_i32_0 = arith.constant 0 : i32
    %c0_i32_1 = arith.constant 0 : i32
    %c0_i32_2 = arith.constant 0 : i32
    return %1, %c0_i32_0, %c0_i32_1 : i32, i32, i32
  }
  func.func @transform_5(%arg0: i32, %arg1: i32, %arg2: memref<2xf32, #tpu.memory_space<smem>>) -> (i32, i32, i32) {
    %c1_i32 = arith.constant 1 : i32
    %0 = arith.subi %arg0, %c1_i32 : i32
    %c0_i32 = arith.constant 0 : i32
    %1 = arith.maxsi %0, %c0_i32 : i32
    %c0_i32_0 = arith.constant 0 : i32
    %c0_i32_1 = arith.constant 0 : i32
    %c0_i32_2 = arith.constant 0 : i32
    return %1, %c0_i32_0, %c0_i32_1 : i32, i32, i32
  }
  func.func @transform_6(%arg0: i32, %arg1: i32, %arg2: memref<2xf32, #tpu.memory_space<smem>>) -> (i32, i32, i32) {
    %c1_i32 = arith.constant 1 : i32
    %0 = arith.subi %arg0, %c1_i32 : i32
    %c0_i32 = arith.constant 0 : i32
    %1 = arith.maxsi %0, %c0_i32 : i32
    %c0_i32_0 = arith.constant 0 : i32
    %c0_i32_1 = arith.constant 0 : i32
    %c0_i32_2 = arith.constant 0 : i32
    return %1, %c0_i32_0, %c0_i32_1 : i32, i32, i32
  }
  func.func @transform_7(%arg0: i32, %arg1: i32, %arg2: memref<2xf32, #tpu.memory_space<smem>>) -> (i32, i32) {
    %c0_i32 = arith.constant 0 : i32
    %c0_i32_0 = arith.constant 0 : i32
    %c0_i32_1 = arith.constant 0 : i32
    return %c0_i32, %c0_i32_0 : i32, i32
  }
  func.func @transform_8(%arg0: i32, %arg1: i32, %arg2: memref<2xf32, #tpu.memory_space<smem>>) -> (i32, i32) {
    %c0_i32 = arith.constant 0 : i32
    %c0_i32_0 = arith.constant 0 : i32
    %c0_i32_1 = arith.constant 0 : i32
    return %c0_i32, %c0_i32_0 : i32, i32
  }
  func.func @transform_9(%arg0: i32, %arg1: i32, %arg2: memref<2xf32, #tpu.memory_space<smem>>) -> (i32, i32) {
    %c0_i32 = arith.constant 0 : i32
    %c0_i32_0 = arith.constant 0 : i32
    %c0_i32_1 = arith.constant 0 : i32
    return %c0_i32, %c0_i32_0 : i32, i32
  }
}

</mosaic_0001>

<bundles_post_ra>
// kernel: net_forward.1
= control target key start
LH: loop header
LB: loop body
LE: loop exit
PB: predicated region body
PF: predicated region fallthrough
CT: control target
= control target key end

     0   :  { %s2399_s0 = inlined_call_operand.vmem [shape: f32[2], index: 0, kind: input, shape index: {}]   ;;  %s2400_s1 = inlined_call_operand.vmem [shape: bf16[128,128], index: 1, kind: input, shape index: {}]   ;;  %s2401_s2 = inlined_call_operand.vmem [shape: s8[128,128], index: 2, kind: input, shape index: {}]   ;;  %s2402_s3 = inlined_call_operand.vmem [shape: bf16[16,128], index: 3, kind: input, shape index: {}]   ;;  %s2403_s4 = inlined_call_operand.vmem [shape: bf16[2,128,128], index: 4, kind: input, shape index: {}]   ;;  %s2404_s5 = inlined_call_operand.vmem [shape: f32[2,1,128], index: 5, kind: input, shape index: {}]   ;;  %s2405_s6 = inlined_call_operand.vmem [shape: bf16[2,128,128], index: 6, kind: input, shape index: {}]   ;;  %s2406_s7 = inlined_call_operand.vmem [shape: f32[2,1,128], index: 7, kind: input, shape index: {}]   ;;  %s2407_s8 = inlined_call_operand.vmem [shape: bf16[384,128], index: 8, kind: input, shape index: {}]   ;;  %s2408_s9 = inlined_call_operand.vmem [shape: f32[1,128], index: 9, kind: input, shape index: {}]   ;;  %s2409_s10 = inlined_call_operand.vmem [shape: f32[16,128], index: 10, kind: output, shape index: {}]  }
   0x1   :  { %s15_s15 = sshll.u32 %s2399_s0, 4  ;;  %s16_s15 = int_to_ptr.vmem [resolvable:$true] %s15_s15 }
   0x2   :  { %s2020_s16 = scalar_lea.vmem %s16_s15, 16  ;;  %p2025_p1 = scmp.lt.s32.totalorder %s16_s15, %s16_s15 }
   0x3   :  { %p2021_p0 = scmp.ne.s32.totalorder %s16_s15, %s2020_s16  ;;  %p2026_p2 = scmp.lt.s32.totalorder %s2020_s16, %s2020_s16 }
   0x5   :  { %p2027_p3 = por %p2026_p2, %p2025_p1 }
   0x7   :  { %p2028_p4 = pnand %p2027_p3, %p2021_p0 }
   0x9   :  { %2031 = shalt.err (!%p2028_p4)  }
   0xa   :  { %s2058_s17 = smov [#allocation5]  }
   0xb   :  { %18 = dma.vmem_to_smem %s16_s15, 16, %s2058_s17, [#allocation4] }
   0xc   :  { %2044 = dma.done.wait [#allocation4], 16 }
   0xd   :  { %2045 = vsyncadd [#allocation4], 4294967280 }
   0xe   :  { %20 = sfence }
   0xf   :  { %s2123_s18 = smov 0   ;;  %s2125_s19 = smov 0  }
  0x10   :  { %s2127_s20 = smov 0  }
  0x11 LB: > { %s38_s0 = sadd.s32 1, %s2052_s19  ;;  %p1628_p5 = scmp.ge.s32.totalorder %s2056_s20, 1  ;;  %s2056_s20 = sphi %s2127_s20, %s26_s20   ;;  %s2052_s19 = sphi %s2125_s19, %s2413_s19   ;;  %s2048_s18 = sphi %s2123_s18, %s2412_s18  }
  0x12   : > { %p40_p6 = scmp.ge.s32.totalorder %s38_s0, 3  ;;  %p422_p7 = scmp.lt.s32.totalorder %s2056_s20, 4 }
  0x14   : > { %s2415_s0 = smov (%p40_p6, %s38_s0), 0  ;;  %p423_p8 = pnand %p1628_p5, %p422_p7 }
  0x15   : > { %2410 = sst [smem:[#allocation7_spill]] %s2415_s0  ;;  %s2144_s21 = sadd.s32 (!%p423_p8), 4294967295, %s2048_s18 }
  0x16   : > { %426 = sbr.rel (%p423_p8) target bundleno = 1502 (0x5de), region = 56  ;;  %p560_p9 = scmp.eq.s32.totalorder (!%p423_p8), %s2048_s18, 0 }
  0x17   : > { %p519_p10 = scmp.gt.s32.totalorder (!%p423_p8), %s2144_s21, 0  ;;  %p1630_p11 = scmp.lt.s32.totalorder (!%p423_p8), %s2144_s21, 1 }
  0x1d   : > { %s2150_s22 = scalar_select %p519_p10, %s2144_s21, 0 }
  0x1e   : > { %565 = sbr.rel (!%p560_p9) target bundleno = 37 (0x25), region = 60  ;;  %v1658_v0 = vld [vmem:[%s2408_s9] ss:$0 sm:$0xff] (%p560_p9) }
  0x1f   : > { %s2153_s23 = scalar_select %p1630_p11, %s2150_s22, 1 }
  0x20   : > { %574 = vst [vmem:[%s2409_s10] sm:$0xff] (%p560_p9), %v1658_v0  ;;  %575 = vst [vmem:[%s2409_s10 + $0x8] sm:$0xff] (%p560_p9), %v1658_v0 }
  0x21   : > { %s1715_s24 = sshll.u32 %s2153_s23, 6  ;;  %s534_s27 = scalar_lea.vmem %s2404_s5, %s2153_s23 }
  0x22   : > { %s2163_s30 = scalar_lea.vmem %s2403_s4, %s1715_s24  ;;  %s2168_s13 = scalar_lea.vmem %s2405_s6, %s1715_s24 }
  0x23   : > { %s554_s16 = scalar_lea.vmem %s2406_s7, %s2153_s23 }
  0x25 PF: > { %v2059_v1 = vmov 0.0   ;;  %p1659_p12 = scmp.ne.s32.totalorder %s2048_s18, 0 }
  0x26   : > { %579 = vst [vmem:[#allocation3] sm:$0xff] %v2059_v1  ;;  %580 = vst [vmem:[#allocation3 + $0x8] sm:$0xff] %v2059_v1  ;;  %v1986_v2 = vld [vmem:[%s2400_s1] sm:$0xff] (!%p1659_p12)   ;;  %v2060_v3 = vmov (!%p1659_p12), 0.0   ;;  %v1987_v4 = vld [vmem:[%s2400_s1 + $0x8] sm:$0xff] (!%p1659_p12)   ;;  %vm2061_vm0 = vmmov (!%p1659_p12), 0  }
  0x27   : > { %583 = sbr.rel (%p1659_p12) target bundleno = 288 (0x120), region = 68  ;;  %1799 = vmatprep.subr.bf16.mxu0 (!%p1659_p12), %v2060_v3  ;;  %652 = vst [vmem:[#allocation2] sm:$0xff] (!%p1659_p12), %v1986_v2  ;;  %v1988_v5 = vld [vmem:[%s2400_s1 + $0x10] sm:$0xff] (!%p1659_p12)   ;;  %1815 = vmatprep.mubr.msk.bf16.mxu0 (!%p1659_p12), %vm2061_vm0, %v2060_v3  ;;  %653 = vst [vmem:[#allocation2 + $0x8] sm:$0xff] (!%p1659_p12), %v1987_v4  ;;  %v1989_v6 = vld [vmem:[%s2400_s1 + $0x18] sm:$0xff] (!%p1659_p12)  }
  0x28   : > { %1800 = vmatpush3.bf16.msra.mxu0 (!%p1659_p12), %v1986_v2  ;;  %654 = vst [vmem:[#allocation2 + $0x10] sm:$0xff] (!%p1659_p12), %v1988_v5  ;;  %v1990_v7 = vld [vmem:[%s2400_s1 + $0x20] sm:$0xff] (!%p1659_p12)   ;;  %655 = vst [vmem:[#allocation2 + $0x18] sm:$0xff] (!%p1659_p12), %v1989_v6  ;;  %v1991_v8 = vld [vmem:[%s2400_s1 + $0x28] sm:$0xff] (!%p1659_p12)  }
  0x29   : > { %1801 = vmatprep.subr.bf16.mxu0 (!%p1659_p12), %v2060_v3  ;;  %656 = vst [vmem:[#allocation2 + $0x20] sm:$0xff] (!%p1659_p12), %v1990_v7  ;;  %v1992_v9 = vld [vmem:[%s2400_s1 + $0x30] sm:$0xff] (!%p1659_p12)   ;;  %657 = vst [vmem:[#allocation2 + $0x28] sm:$0xff] (!%p1659_p12), %v1991_v8  ;;  %v1993_v10 = vld [vmem:[%s2400_s1 + $0x38] sm:$0xff] (!%p1659_p12)  }
  0x2a   : > { %658 = vst [vmem:[#allocation2 + $0x30] sm:$0xff] (!%p1659_p12), %v1992_v9  ;;  %659 = vst [vmem:[#allocation2 + $0x38] sm:$0xff] (!%p1659_p12), %v1993_v10  ;;  %v1994_v11 = vld [vmem:[%s2402_s3] sm:$0xff] (!%p1659_p12)  }
  0x2c   : > { %1802 = vmatpush3.bf16.msra.mxu0 (!%p1659_p12), %v1987_v4 }
  0x2d   : > { %1803 = vmatprep.subr.bf16.mxu0 (!%p1659_p12), %v2060_v3  ;;  %v660_v12 = vld [vmem:[#allocation3] sm:$0xff] (!%p1659_p12)  ;;  %v661_v14 = vld [vmem:[#allocation3 + $0x8] sm:$0xff] (!%p1659_p12) }
  0x30   : > { %1804 = vmatpush3.bf16.msra.mxu0 %v1988_v5 }
  0x31   : > { %1805 = vmatprep.subr.bf16.mxu0 %v2060_v3 }
  0x34   : > { %1806 = vmatpush3.bf16.msra.mxu0 %v1989_v6 }
  0x35   : > { %1807 = vmatprep.subr.bf16.mxu0 %v2060_v3 }
  0x38   : > { %1808 = vmatpush3.bf16.msra.mxu0 %v1990_v7 }
  0x39   : > { %1809 = vmatprep.subr.bf16.mxu0 %v2060_v3 }
  0x3c   : > { %1810 = vmatpush3.bf16.msra.mxu0 %v1991_v8 }
  0x3d   : > { %1811 = vmatprep.subr.bf16.mxu0 %v2060_v3 }
  0x40   : > { %1812 = vmatpush3.bf16.msra.mxu0 %v1992_v9 }
  0x41   : > { %1813 = vmatprep.subr.bf16.mxu0 %v2060_v3 }
  0x44   : > { %1814 = vmatpush3.bf16.msra.mxu0 %v1993_v10 }
  0x47   : > { %1816 = vmatmul.mubr.bf16.vlgmr.msra.gmra.mrb[0].mxu0 %v1994_v11 }
 0x11a   : > { %v704_v13 = vpop.f32.mrb[0].mxu0 }
 0x11b   : > { %v711_v15 = vadd.f32 %v704_v13, %v660_v12  ;;  %v1817_v16 = vpop.f32.mrb[1].mxu0 }
 0x11c   : > { %v707_v17 = vpop.f32.mrb[2].mxu0 }
 0x11d   : > { %713 = vst [vmem:[#allocation3] sm:$0xff] %v711_v15  ;;  %v712_v18 = vadd.f32 %v707_v17, %v661_v14  ;;  %v1818_v19 = vpop.f32.mrb[3].mxu0 }
 0x11f   : > { %714 = vst [vmem:[#allocation3 + $0x8] sm:$0xff] %v712_v18 }
 0x120 PF: > { %p1669_p13 = scmp.le.s32.totalorder %s2048_s18, 0 }
 0x121   : > { %p720_p0 = scmp.lt.s32.totalorder (!%p1669_p13), %s2144_s21, 0  ;;  %s721_s25 = ssub.s32 (!%p1669_p13), 0, %s2144_s21  ;;  %v771_v20 = vld [vmem:[%s2401_s2] sm:$0xff] (!%p1669_p13)  ;;  %v1996_v23 = vld [vmem:[%s2163_s30 + $0x8] sm:$0xff] (!%p1669_p13)   ;;  %v1997_v24 = vld [vmem:[%s2163_s30 + $0x10] sm:$0xff] (!%p1669_p13)   ;;  %vm2063_vm1 = vmmov (!%p1669_p13), 0  }
 0x122   : > { %718 = sbr.rel (%p1669_p13) target bundleno = 1249 (0x4e1), region = 72  ;;  %s1671_s29 = smin.u32 (!%p1669_p13), %s2144_s21, %s721_s25  ;;  %v775_v21 = vunpack.c.l.s8.bf16 (!%p1669_p13), %v771_v20  ;;  %v1995_v22 = vld [vmem:[%s2163_s30] sm:$0xff] (!%p1669_p13)   ;;  %v1998_v25 = vld [vmem:[%s2163_s30 + $0x18] sm:$0xff] (!%p1669_p13)   ;;  %v2000_v29 = vld [vmem:[%s2163_s30 + $0x28] sm:$0xff] (!%p1669_p13)   ;;  %v776_v37 = vunpack.c.h.s8.bf16 (!%p1669_p13), %v771_v20 }
 0x123   : > { %s723_s24 = sand.u32 (!%p1669_p13), 1, %s1671_s29   ;;  %1851 = vmatprep.subr.bf16.mxu1 (!%p1669_p13), %v1995_v22  ;;  %v1999_v28 = vld [vmem:[%s2163_s30 + $0x20] sm:$0xff] (!%p1669_p13)   ;;  %v772_v36 = vld [vmem:[%s2401_s2 + $0x8] sm:$0xff] (!%p1669_p13)  ;;  %v773_v39 = vld [vmem:[%s2401_s2 + $0x10] sm:$0xff] (!%p1669_p13)  ;;  %p733_p2 = scmp.lt.s32.totalorder (!%p1669_p13), %s2048_s18, 0 }
 0x124   : > { %s724_s0 = ssub.s32 (!%p1669_p13), 0, %s723_s24  ;;  %1835 = vmatprep.mubr.bf16.mxu0 (!%p1669_p13), %v775_v21  ;;  %1852 = vmatpush3.bf16.msra.mxu1 (!%p1669_p13), %v1995_v22  ;;  %v777_v38 = vunpack.c.l.s8.bf16 (!%p1669_p13), %v772_v36  ;;  %v778_v40 = vunpack.c.h.s8.bf16 (!%p1669_p13), %v772_v36  ;;  %v779_v41 = vunpack.c.l.s8.bf16 (!%p1669_p13), %v773_v39  ;;  %v774_v42 = vld [vmem:[%s2401_s2 + $0x18] sm:$0xff] (!%p1669_p13)  ;;  %v780_v43 = vunpack.c.h.s8.bf16 (!%p1669_p13), %v773_v39  ;;  %v2001_v46 = vld [vmem:[%s2163_s30 + $0x30] sm:$0xff] (!%p1669_p13)   ;;  %v2003_v48 = vld [vmem:[%s2168_s13] sm:$0xff] (!%p1669_p13)  }
 0x125   : > { %1853 = vmatprep.subr.bf16.mxu1 (!%p1669_p13), %v1996_v23  ;;  %v781_v44 = vunpack.c.l.s8.bf16 (!%p1669_p13), %v774_v42  ;;  %v782_v45 = vunpack.c.h.s8.bf16 (!%p1669_p13), %v774_v42  ;;  %v2002_v47 = vld [vmem:[%s2163_s30 + $0x38] sm:$0xff] (!%p1669_p13)   ;;  %v2004_v49 = vld [vmem:[%s2168_s13 + $0x8] sm:$0xff] (!%p1669_p13)   ;;  %v2005_v50 = vld [vmem:[%s2168_s13 + $0x10] sm:$0xff] (!%p1669_p13)   ;;  %s785_s30 = sld [smem:[#allocation5 + %s2150_s22]] (!%p1669_p13) }
 0x126   : > { %v2006_v51 = vld [vmem:[%s2168_s13 + $0x18] sm:$0xff] (!%p1669_p13)   ;;  %v2007_v52 = vld [vmem:[%s2168_s13 + $0x20] sm:$0xff] (!%p1669_p13)   ;;  %v2008_v53 = vld [vmem:[%s2168_s13 + $0x28] sm:$0xff] (!%p1669_p13)  }
 0x128   : > { %1854 = vmatpush3.bf16.msra.mxu1 (!%p1669_p13), %v1996_v23 }
 0x129   : > { %s2417_s0 = smov (!%p720_p0, %s724_s0), %s723_s24  ;;  %1855 = vmatprep.subr.bf16.mxu1 %v1997_v24 }
 0x12a   : > { %p1673_p1 = scmp.lt.s32.totalorder %s2417_s0, 0  ;;  %s730_s11 = sadd.s32 2, %s2417_s0 }
 0x12b   : > { %v2278_v56 = vstv %s785_s30 }
 0x12c   : > { %s2419_s11 = smov (!%p1673_p1, %s730_s11), %s2417_s0  ;;  %1856 = vmatpush3.bf16.msra.mxu1 %v1997_v24 }
 0x12d   : > { %s1674_s12 = sshll.u32 %s2419_s11, 7  ;;  %1857 = vmatprep.subr.bf16.mxu1 %v1998_v25 }
 0x12e   : > { %s746_s21 = sshra.s32 %s1674_s12, 4 }
 0x12f   : > { %s1679_s14 = sshll.u32 %s746_s21, 3 }
 0x130   : > { %s749_s15 = scalar_lea.vmem [#allocation2], %s1679_s14  ;;  %1858 = vmatpush3.bf16.msra.mxu1 %v1998_v25 }
 0x131   : > { %v2224_v26 = vld [vmem:[%s749_s15] sm:$0xff]  ;;  %v2226_v27 = vld [vmem:[%s749_s15 + $0x8] sm:$0xff]  ;;  %v2233_v30 = vld [vmem:[%s749_s15 + $0x10] sm:$0xff]  ;;  %1859 = vmatprep.subr.bf16.mxu1 %v1999_v28 }
 0x132   : > { %1819 = vmatprep.subr.bf16.mxu0 %v2224_v26  ;;  %v2237_v31 = vld [vmem:[%s749_s15 + $0x18] sm:$0xff]  ;;  %v2241_v32 = vld [vmem:[%s749_s15 + $0x20] sm:$0xff]  ;;  %v2245_v33 = vld [vmem:[%s749_s15 + $0x28] sm:$0xff]  ;;  %v788_v54 = vunpack.c.l.bf16 %v2226_v27  ;;  %v789_v55 = vunpack.c.h.bf16 %v2226_v27  ;;  %v786_v57 = vunpack.c.l.bf16 %v2224_v26  ;;  %v787_v58 = vunpack.c.h.bf16 %v2224_v26 }
 0x133   : > { %1820 = vmatpush3.bf16.msra.mxu0 %v2224_v26  ;;  %v2249_v34 = vld [vmem:[%s749_s15 + $0x30] sm:$0xff]  ;;  %v2253_v35 = vld [vmem:[%s749_s15 + $0x38] sm:$0xff]  ;;  %v792_v6 = vunpack.c.l.bf16 %v2237_v31  ;;  %v793_v7 = vunpack.c.h.bf16 %v2237_v31  ;;  %v790_v10 = vunpack.c.l.bf16 %v2233_v30  ;;  %v791_v11 = vunpack.c.h.bf16 %v2233_v30 }
 0x134   : > { %1821 = vmatprep.subr.bf16.mxu0 %v2226_v27  ;;  %1860 = vmatpush3.bf16.msra.mxu1 %v1999_v28  ;;  %v805_v59 = vmul.f32 %v2278_v56, %v788_v54  ;;  %v806_v60 = vmul.f32 %v2278_v56, %v789_v55  ;;  %v803_v62 = vmul.f32 %v2278_v56, %v786_v57  ;;  %v796_v24 = vunpack.c.l.bf16 %v2245_v33 }
 0x135   : > { %1861 = vmatprep.subr.bf16.mxu1 %v2000_v29  ;;  %v804_v63 = vmul.f32 %v2278_v56, %v787_v58  ;;  %v809_v14 = vmul.f32 %v2278_v56, %v792_v6  ;;  %v810_v15 = vmul.f32 %v2278_v56, %v793_v7  ;;  %v807_v17 = vmul.f32 %v2278_v56, %v790_v10 }
 0x136   : > { %v808_v18 = vmul.f32 %v2278_v56, %v791_v11  ;;  %v797_v25 = vunpack.c.h.bf16 %v2245_v33  ;;  %v794_v28 = vunpack.c.l.bf16 %v2241_v32  ;;  %v813_v36 = vmul.f32 %v2278_v56, %v796_v24 }
 0x137   : > { %1822 = vmatpush3.bf16.msra.mxu0 %v2226_v27 }
 0x138   : > { %1823 = vmatprep.subr.bf16.mxu0 %v2233_v30  ;;  %1862 = vmatpush3.bf16.msra.mxu1 %v2000_v29  ;;  %v795_v29 = vunpack.c.h.bf16 %v2241_v32  ;;  %v811_v39 = vmul.f32 %v2278_v56, %v794_v28 }
 0x139   : > { %1863 = vmatprep.subr.bf16.mxu1 %v2001_v46 }
 0x13b   : > { %1824 = vmatpush3.bf16.msra.mxu0 %v2233_v30 }
 0x13c   : > { %1825 = vmatprep.subr.bf16.mxu0 %v2237_v31  ;;  %1864 = vmatpush3.bf16.msra.mxu1 %v2001_v46 }
 0x13d   : > { %1865 = vmatprep.subr.bf16.mxu1 %v2002_v47 }
 0x13f   : > { %1826 = vmatpush3.bf16.msra.mxu0 %v2237_v31 }
 0x140   : > { %1827 = vmatprep.subr.bf16.mxu0 %v2241_v32  ;;  %1866 = vmatpush3.bf16.msra.mxu1 %v2002_v47 }
 0x143   : > { %1828 = vmatpush3.bf16.msra.mxu0 %v2241_v32  ;;  %v800_v32 = vunpack.c.l.bf16 %v2253_v35 }
 0x144   : > { %1829 = vmatprep.subr.bf16.mxu0 %v2245_v33 }
 0x147   : > { %1830 = vmatpush3.bf16.msra.mxu0 %v2245_v33 }
 0x148   : > { %1831 = vmatprep.subr.bf16.mxu0 %v2249_v34 }
 0x14b   : > { %1832 = vmatpush3.bf16.msra.mxu0 %v2249_v34 }
 0x14c   : > { %1833 = vmatprep.subr.bf16.mxu0 %v2253_v35 }
 0x14f   : > { %1834 = vmatpush3.bf16.msra.mxu0 %v2253_v35 }
 0x150   : > { %1883 = vmatprep.subr.bf16.mxu0 %v2003_v48 }
 0x152   : > { %1836 = vmatmul.mubr.bf16.vlgmr.msra.gmra.mrb[0].mxu0 %v776_v37  ;;  %v814_v37 = vmul.f32 %v2278_v56, %v797_v25 }
 0x153   : > { %1839 = vmatprep.mubr.bf16.mxu0 %v777_v38  ;;  %1884 = vmatpush3.bf16.msra.mxu0 %v2003_v48  ;;  %v798_v48 = vunpack.c.l.bf16 %v2249_v34 }
 0x154   : > { %1885 = vmatprep.subr.bf16.mxu0 %v2004_v49 }
 0x155   : > { %v815_v55 = vmul.f32 %v2278_v56, %v798_v48 }
 0x157   : > { %1886 = vmatpush3.bf16.msra.mxu0 %v2004_v49  ;;  %v799_v49 = vunpack.c.h.bf16 %v2249_v34 }
 0x158   : > { %1887 = vmatprep.subr.bf16.mxu0 %v2005_v50 }
 0x159   : > { %v816_v57 = vmul.f32 %v2278_v56, %v799_v49 }
 0x15a   : > { %1840 = vmatmul.mubr.bf16.gmra.mrb[4].mxu0 %v778_v40  ;;  %v812_v40 = vmul.f32 %v2278_v56, %v795_v29 }
 0x15b   : > { %1843 = vmatprep.mubr.bf16.mxu0 %v779_v41  ;;  %1888 = vmatpush3.bf16.msra.mxu0 %v2005_v50 }
 0x15c   : > { %1889 = vmatprep.subr.bf16.mxu0 %v2006_v51 }
 0x15f   : > { %1890 = vmatpush3.bf16.msra.mxu0 %v2006_v51 }
 0x160   : > { %1891 = vmatprep.subr.bf16.mxu0 %v2007_v52 }
 0x162   : > { %1844 = vmatmul.mubr.bf16.gmra.mrb[8].mxu0 %v780_v43 }
 0x163   : > { %1847 = vmatprep.mubr.bf16.mxu0 %v781_v44  ;;  %1892 = vmatpush3.bf16.msra.mxu0 %v2007_v52  ;;  %v817_v52 = vmul.f32 %v2278_v56, %v800_v32 }
 0x164   : > { %1893 = vmatprep.subr.bf16.mxu0 %v2008_v53 }
 0x167   : > { %1894 = vmatpush3.bf16.msra.mxu0 %v2008_v53 }
 0x16a   : > { %1848 = vmatmul.mubr.bf16.gmra.mrb[12].mxu0 %v782_v45  ;;  %v801_v45 = vunpack.c.h.bf16 %v2253_v35 }
 0x16c   : > { %v818_v53 = vmul.f32 %v2278_v56, %v801_v45  ;;  %v1681_v56 = vld [vmem:[%s534_s27] ss:$0 sm:$0xff]  ;;  %s734_s27 = ssub.s32 0, %s2048_s18 }
 0x225   : > { %v1837_v61 = vpop.f32.mrb[0].mxu0 }
 0x226   : > { %v853_v0 = vpop.f32.mrb[1].mxu0  ;;  %v862_v3 = vadd.f32 %v1837_v61, %v805_v59 }
 0x227   : > { %v1838_v2 = vpop.f32.mrb[2].mxu0  ;;  %v854_v8 = vadd.f32 %v853_v0, %v803_v62 }
 0x228   : > { %v865_v4 = vadd.f32 %v1838_v2, %v806_v60  ;;  %v856_v5 = vpop.f32.mrb[3].mxu0  ;;  %v2009_v2 = vld [vmem:[%s2168_s13 + $0x30] sm:$0xff]  }
 0x229   : > { %v857_v9 = vadd.f32 %v856_v5, %v804_v63  ;;  %1895 = vmatprep.subr.bf16.mxu0 %v2009_v2 }
 0x22a   : > { %v917_v12 = vpack.c.bf16 %v865_v4, %v862_v3  ;;  %1896 = vmatpush3.bf16.msra.mxu0 %v2009_v2  ;;  %v2010_v3 = vld [vmem:[%s2168_s13 + $0x38] sm:$0xff]   ;;  %s1675_s13 = smin.u32 %s2048_s18, %s734_s27 }
 0x22b   : > { %v916_v13 = vpack.c.bf16 %v857_v9, %v854_v8  ;;  %1897 = vmatprep.subr.bf16.mxu0 %v2010_v3  ;;  %s736_s11 = sand.u32 1, %s1675_s13  }
 0x22c   : > { %s737_s12 = ssub.s32 0, %s736_s11 }
 0x22d   : > { %v1841_v16 = vpop.f32.mrb[4].mxu0  ;;  %1867 = vmatprep.mubr.bf16.mxu1 %v916_v13  ;;  %s2421_s12 = smov (!%p733_p2, %s737_s12), %s736_s11 }
 0x22e   : > { %v869_v19 = vpop.f32.mrb[5].mxu0  ;;  %1868 = vmatmul.mubr.bf16.vlgmr.msra.gmra.mrb[0].mxu1 %v917_v12  ;;  %v878_v21 = vadd.f32 %v1841_v16, %v809_v14  ;;  %1898 = vmatpush3.bf16.msra.mxu0 %v2010_v3  ;;  %p1677_p3 = scmp.lt.s32.totalorder %s2421_s12, 0  ;;  %s743_s21 = sadd.s32 2, %s2421_s12 }
 0x22f   : > { %v1842_v20 = vpop.f32.mrb[6].mxu0  ;;  %v870_v26 = vadd.f32 %v869_v19, %v807_v17 }
 0x230   : > { %v881_v22 = vadd.f32 %v1842_v20, %v810_v15  ;;  %v872_v23 = vpop.f32.mrb[7].mxu0  ;;  %s2423_s21 = smov (!%p1677_p3, %s743_s21), %s2421_s12 }
 0x231   : > { %v873_v27 = vadd.f32 %v872_v23, %v808_v18  ;;  %s1678_s14 = sshll.u32 %s2423_s21, 7 }
 0x232   : > { %v919_v30 = vpack.c.bf16 %v881_v22, %v878_v21  ;;  %s1309_s25 = sshra.s32 %s1678_s14, 4 }
 0x233   : > { %v918_v31 = vpack.c.bf16 %v873_v27, %v870_v26  ;;  %s1699_s26 = sshll.u32 %s1309_s25, 3 }
 0x234   : > { %s2333_s23 = scalar_lea.vmem [#allocation2], %s1699_s26 }
 0x235   : > { %v1845_v38 = vpop.f32.mrb[8].mxu0  ;;  %1871 = vmatprep.mubr.bf16.mxu1 %v918_v31 }
 0x236   : > { %v885_v41 = vpop.f32.mrb[9].mxu0  ;;  %1872 = vmatmul.mubr.bf16.gmra.mrb[4].mxu1 %v919_v30  ;;  %v894_v42 = vadd.f32 %v1845_v38, %v813_v36 }
 0x237   : > { %v1846_v33 = vpop.f32.mrb[10].mxu0  ;;  %v886_v46 = vadd.f32 %v885_v41, %v811_v39 }
 0x238   : > { %v897_v43 = vadd.f32 %v1846_v33, %v814_v37  ;;  %v888_v44 = vpop.f32.mrb[11].mxu0 }
 0x239   : > { %v889_v47 = vadd.f32 %v888_v44, %v812_v40 }
 0x23a   : > { %v921_v50 = vpack.c.bf16 %v897_v43, %v894_v42 }
 0x23b   : > { %v920_v51 = vpack.c.bf16 %v889_v47, %v886_v46 }
 0x23d   : > { %v1849_v54 = vpop.f32.mrb[12].mxu0  ;;  %1875 = vmatprep.mubr.bf16.mxu1 %v920_v51 }
 0x23e   : > { %v901_v35 = vpop.f32.mrb[13].mxu0  ;;  %1876 = vmatmul.mubr.bf16.gmra.mrb[8].mxu1 %v921_v50  ;;  %v910_v59 = vadd.f32 %v1849_v54, %v817_v52 }
 0x23f   : > { %v1850_v58 = vpop.f32.mrb[14].mxu0  ;;  %v902_v61 = vadd.f32 %v901_v35, %v815_v55 }
 0x240   : > { %v913_v34 = vadd.f32 %v1850_v58, %v818_v53  ;;  %v904_v60 = vpop.f32.mrb[15].mxu0 }
 0x241   : > { %v905_v62 = vadd.f32 %v904_v60, %v816_v57 }
 0x242   : > { %v923_v63 = vpack.c.bf16 %v913_v34, %v910_v59 }
 0x243   : > { %v922_v0 = vpack.c.bf16 %v905_v62, %v902_v61  ;;  %v2062_v61 = vmov 0.0   ;;  %v2327_v62 = vld [vmem:[%s554_s16] ss:$0 sm:$0xff] }
 0x244   : > { %1915 = vmatprep.subr.bf16.mxu1 %v2062_v61 }
 0x245   : > { %1879 = vmatprep.mubr.bf16.mxu1 %v922_v0 }
 0x246   : > { %1880 = vmatmul.mubr.bf16.gmra.mrb[12].mxu1 %v923_v63 }
 0x247   : > { %1931 = vmatprep.mubr.msk.bf16.mxu1 %vm2063_vm1, %v2062_v61 }
 0x301   : > { %v1869_v4 = vpop.f32.mrb[0].mxu1 }
 0x302   : > { %v1038_v5 = vadd.f32 %v1869_v4, %v1681_v56  ;;  %v1029_v6 = vpop.f32.mrb[1].mxu1 }
 0x303   : > { %v1030_v7 = vadd.f32 %v1681_v56, %v1029_v6  ;;  %v1870_v8 = vpop.f32.mrb[2].mxu1 }
 0x304   : > { %v1041_v9 = vadd.f32 %v1870_v8, %v1681_v56  ;;  %v1032_v10 = vpop.f32.mrb[3].mxu1  ;;  %v1094_v12 = vmax.f32 %v1038_v5, 0.0 }
 0x305   : > { %v1033_v11 = vadd.f32 %v1681_v56, %v1032_v10  ;;  %v1092_v14 = vmax.f32 %v1030_v7, 0.0 }
 0x306   : > { %v1095_v13 = vmax.f32 %v1041_v9, 0.0 }
 0x307   : > { %v1093_v15 = vmax.f32 %v1033_v11, 0.0 }
 0x308   : > { %v1109_v16 = vpack.c.bf16 %v1095_v13, %v1094_v12 }
 0x309   : > { %v1108_v17 = vpack.c.bf16 %v1093_v15, %v1092_v14  ;;  %v1873_v18 = vpop.f32.mrb[4].mxu1 }
 0x30a   : > { %v1054_v19 = vadd.f32 %v1873_v18, %v1681_v56  ;;  %v1045_v20 = vpop.f32.mrb[5].mxu1 }
 0x30b   : > { %v1046_v21 = vadd.f32 %v1681_v56, %v1045_v20  ;;  %v1874_v22 = vpop.f32.mrb[6].mxu1  ;;  %1899 = vmatprep.mubr.bf16.mxu0 %v1108_v17 }
 0x30c   : > { %v1057_v23 = vadd.f32 %v1874_v22, %v1681_v56  ;;  %v1048_v24 = vpop.f32.mrb[7].mxu1  ;;  %1900 = vmatmul.mubr.bf16.vlgmr.msra.gmra.mrb[16].mxu0 %v1109_v16  ;;  %v1098_v26 = vmax.f32 %v1054_v19, 0.0 }
 0x30d   : > { %v1049_v25 = vadd.f32 %v1681_v56, %v1048_v24  ;;  %v1096_v28 = vmax.f32 %v1046_v21, 0.0 }
 0x30e   : > { %v1099_v27 = vmax.f32 %v1057_v23, 0.0 }
 0x30f   : > { %v1097_v29 = vmax.f32 %v1049_v25, 0.0 }
 0x310   : > { %v1111_v30 = vpack.c.bf16 %v1099_v27, %v1098_v26 }
 0x311   : > { %v1110_v31 = vpack.c.bf16 %v1097_v29, %v1096_v28  ;;  %v1877_v36 = vpop.f32.mrb[8].mxu1 }
 0x312   : > { %v1070_v37 = vadd.f32 %v1877_v36, %v1681_v56  ;;  %v1061_v38 = vpop.f32.mrb[9].mxu1 }
 0x313   : > { %v1062_v39 = vadd.f32 %v1681_v56, %v1061_v38  ;;  %v1878_v40 = vpop.f32.mrb[10].mxu1  ;;  %1903 = vmatprep.mubr.bf16.mxu0 %v1110_v31 }
 0x314   : > { %v1073_v41 = vadd.f32 %v1878_v40, %v1681_v56  ;;  %v1064_v33 = vpop.f32.mrb[11].mxu1  ;;  %1904 = vmatmul.mubr.bf16.gmra.mrb[20].mxu0 %v1111_v30  ;;  %v1102_v43 = vmax.f32 %v1070_v37, 0.0 }
 0x315   : > { %v1065_v42 = vadd.f32 %v1681_v56, %v1064_v33  ;;  %v1100_v32 = vmax.f32 %v1062_v39, 0.0 }
 0x316   : > { %v1103_v44 = vmax.f32 %v1073_v41, 0.0 }
 0x317   : > { %v1101_v45 = vmax.f32 %v1065_v42, 0.0 }
 0x318   : > { %v1113_v46 = vpack.c.bf16 %v1103_v44, %v1102_v43 }
 0x319   : > { %v1112_v47 = vpack.c.bf16 %v1101_v45, %v1100_v32  ;;  %v1881_v48 = vpop.f32.mrb[12].mxu1 }
 0x31a   : > { %v1086_v49 = vadd.f32 %v1881_v48, %v1681_v56  ;;  %v1077_v50 = vpop.f32.mrb[13].mxu1 }
 0x31b   : > { %v1078_v51 = vadd.f32 %v1681_v56, %v1077_v50  ;;  %v1882_v52 = vpop.f32.mrb[14].mxu1  ;;  %1907 = vmatprep.mubr.bf16.mxu0 %v1112_v47 }
 0x31c   : > { %v1089_v53 = vadd.f32 %v1882_v52, %v1681_v56  ;;  %v1080_v54 = vpop.f32.mrb[15].mxu1  ;;  %1908 = vmatmul.mubr.bf16.gmra.mrb[24].mxu0 %v1113_v46  ;;  %v1106_v57 = vmax.f32 %v1086_v49, 0.0 }
 0x31d   : > { %v1081_v55 = vadd.f32 %v1681_v56, %v1080_v54  ;;  %v1104_v58 = vmax.f32 %v1078_v51, 0.0 }
 0x31e   : > { %v1107_v35 = vmax.f32 %v1089_v53, 0.0 }
 0x31f   : > { %v1105_v59 = vmax.f32 %v1081_v55, 0.0 }
 0x320   : > { %v1115_v34 = vpack.c.bf16 %v1107_v35, %v1106_v57  ;;  %v2011_v35 = vld [vmem:[%s2402_s3] sm:$0xff]  }
 0x321   : > { %v1114_v60 = vpack.c.bf16 %v1105_v59, %v1104_v58  ;;  %v1321_v58 = vld [vmem:[#allocation3] sm:$0xff] }
 0x323   : > { %1911 = vmatprep.mubr.bf16.mxu0 %v1114_v60 }
 0x324   : > { %1912 = vmatmul.mubr.bf16.gmra.mrb[28].mxu0 %v1115_v34  ;;  %v1322_v34 = vld [vmem:[#allocation3 + $0x8] sm:$0xff] }
 0x3df   : > { %v1901_v63 = vpop.f32.mrb[16].mxu0 }
 0x3e0   : > { %v1230_v0 = vadd.f32 %v1901_v63, %v2327_v62  ;;  %v1221_v2 = vpop.f32.mrb[17].mxu0 }
 0x3e1   : > { %v1222_v3 = vadd.f32 %v2327_v62, %v1221_v2  ;;  %v1902_v56 = vpop.f32.mrb[18].mxu0 }
 0x3e2   : > { %v1233_v4 = vadd.f32 %v1902_v56, %v2327_v62  ;;  %v1224_v5 = vpop.f32.mrb[19].mxu0  ;;  %v1286_v7 = vmax.f32 %v1230_v0, 0.0 }
 0x3e3   : > { %v1225_v6 = vadd.f32 %v2327_v62, %v1224_v5  ;;  %v1284_v9 = vmax.f32 %v1222_v3, 0.0 }
 0x3e4   : > { %v1287_v8 = vmax.f32 %v1233_v4, 0.0 }
 0x3e5   : > { %v1285_v10 = vmax.f32 %v1225_v6, 0.0 }
 0x3e6   : > { %v1301_v11 = vpack.c.bf16 %v1287_v8, %v1286_v7 }
 0x3e7   : > { %v1300_v12 = vpack.c.bf16 %v1285_v10, %v1284_v9  ;;  %v1905_v13 = vpop.f32.mrb[20].mxu0 }
 0x3e8   : > { %1314 = vst [vmem:[%s2333_s23 + $0x8] sm:$0xff] %v1301_v11  ;;  %v1246_v14 = vadd.f32 %v1905_v13, %v2327_v62  ;;  %v1237_v15 = vpop.f32.mrb[21].mxu0 }
 0x3e9   : > { %1313 = vst [vmem:[%s2333_s23] sm:$0xff] %v1300_v12  ;;  %v1238_v16 = vadd.f32 %v2327_v62, %v1237_v15  ;;  %v1906_v17 = vpop.f32.mrb[22].mxu0  ;;  %1916 = vmatpush3.bf16.msra.mxu1 %v1300_v12 }
 0x3ea   : > { %v1249_v18 = vadd.f32 %v1906_v17, %v2327_v62  ;;  %v1240_v19 = vpop.f32.mrb[23].mxu0  ;;  %1917 = vmatprep.subr.bf16.mxu1 %v2062_v61  ;;  %v1290_v21 = vmax.f32 %v1246_v14, 0.0 }
 0x3eb   : > { %v1241_v20 = vadd.f32 %v2327_v62, %v1240_v19  ;;  %v1288_v23 = vmax.f32 %v1238_v16, 0.0 }
 0x3ec   : > { %v1291_v22 = vmax.f32 %v1249_v18, 0.0 }
 0x3ed   : > { %v1289_v24 = vmax.f32 %v1241_v20, 0.0  ;;  %1918 = vmatpush3.bf16.msra.mxu1 %v1301_v11 }
 0x3ee   : > { %v1303_v25 = vpack.c.bf16 %v1291_v22, %v1290_v21  ;;  %1919 = vmatprep.subr.bf16.mxu1 %v2062_v61 }
 0x3ef   : > { %v1302_v26 = vpack.c.bf16 %v1289_v24, %v1288_v23  ;;  %v1909_v27 = vpop.f32.mrb[24].mxu0 }
 0x3f0   : > { %1316 = vst [vmem:[%s2333_s23 + $0x18] sm:$0xff] %v1303_v25  ;;  %v1262_v28 = vadd.f32 %v1909_v27, %v2327_v62  ;;  %v1253_v29 = vpop.f32.mrb[25].mxu0 }
 0x3f1   : > { %1315 = vst [vmem:[%s2333_s23 + $0x10] sm:$0xff] %v1302_v26  ;;  %v1254_v30 = vadd.f32 %v2327_v62, %v1253_v29  ;;  %v1910_v31 = vpop.f32.mrb[26].mxu0  ;;  %1920 = vmatpush3.bf16.msra.mxu1 %v1302_v26 }
 0x3f2   : > { %v1265_v36 = vadd.f32 %v1910_v31, %v2327_v62  ;;  %v1256_v37 = vpop.f32.mrb[27].mxu0  ;;  %1921 = vmatprep.subr.bf16.mxu1 %v2062_v61  ;;  %v1294_v39 = vmax.f32 %v1262_v28, 0.0 }
 0x3f3   : > { %v1257_v38 = vadd.f32 %v2327_v62, %v1256_v37  ;;  %v1292_v41 = vmax.f32 %v1254_v30, 0.0 }
 0x3f4   : > { %v1295_v40 = vmax.f32 %v1265_v36, 0.0 }
 0x3f5   : > { %v1293_v33 = vmax.f32 %v1257_v38, 0.0  ;;  %1922 = vmatpush3.bf16.msra.mxu1 %v1303_v25 }
 0x3f6   : > { %v1305_v42 = vpack.c.bf16 %v1295_v40, %v1294_v39  ;;  %1923 = vmatprep.subr.bf16.mxu1 %v2062_v61 }
 0x3f7   : > { %v1304_v43 = vpack.c.bf16 %v1293_v33, %v1292_v41  ;;  %v1913_v44 = vpop.f32.mrb[28].mxu0 }
 0x3f8   : > { %1318 = vst [vmem:[%s2333_s23 + $0x28] sm:$0xff] %v1305_v42  ;;  %v1278_v32 = vadd.f32 %v1913_v44, %v2327_v62  ;;  %v1269_v45 = vpop.f32.mrb[29].mxu0 }
 0x3f9   : > { %1317 = vst [vmem:[%s2333_s23 + $0x20] sm:$0xff] %v1304_v43  ;;  %v1270_v46 = vadd.f32 %v2327_v62, %v1269_v45  ;;  %v1914_v47 = vpop.f32.mrb[30].mxu0  ;;  %1924 = vmatpush3.bf16.msra.mxu1 %v1304_v43 }
 0x3fa   : > { %v1281_v48 = vadd.f32 %v1914_v47, %v2327_v62  ;;  %v1272_v49 = vpop.f32.mrb[31].mxu0  ;;  %1925 = vmatprep.subr.bf16.mxu1 %v2062_v61  ;;  %v1298_v51 = vmax.f32 %v1278_v32, 0.0 }
 0x3fb   : > { %v1273_v50 = vadd.f32 %v2327_v62, %v1272_v49  ;;  %v1296_v53 = vmax.f32 %v1270_v46, 0.0 }
 0x3fc   : > { %v1299_v52 = vmax.f32 %v1281_v48, 0.0 }
 0x3fd   : > { %v1297_v54 = vmax.f32 %v1273_v50, 0.0  ;;  %1926 = vmatpush3.bf16.msra.mxu1 %v1305_v42 }
 0x3fe   : > { %v1307_v55 = vpack.c.bf16 %v1299_v52, %v1298_v51  ;;  %1927 = vmatprep.subr.bf16.mxu1 %v2062_v61 }
 0x3ff   : > { %v1306_v57 = vpack.c.bf16 %v1297_v54, %v1296_v53 }
 0x400   : > { %1320 = vst [vmem:[%s2333_s23 + $0x38] sm:$0xff] %v1307_v55 }
 0x401   : > { %1319 = vst [vmem:[%s2333_s23 + $0x30] sm:$0xff] %v1306_v57  ;;  %1928 = vmatpush3.bf16.msra.mxu1 %v1306_v57 }
 0x402   : > { %1929 = vmatprep.subr.bf16.mxu1 %v2062_v61 }
 0x405   : > { %1930 = vmatpush3.bf16.msra.mxu1 %v1307_v55 }
 0x408   : > { %1932 = vmatmul.mubr.bf16.vlgmr.msra.gmra.mrb[16].mxu1 %v2011_v35 }
 0x4db   : > { %v1365_v59 = vpop.f32.mrb[16].mxu1 }
 0x4dc   : > { %v1372_v60 = vadd.f32 %v1365_v59, %v1321_v58  ;;  %v1933_v62 = vpop.f32.mrb[17].mxu1 }
 0x4dd   : > { %v1368_v63 = vpop.f32.mrb[18].mxu1 }
 0x4de   : > { %1374 = vst [vmem:[#allocation3] sm:$0xff] %v1372_v60  ;;  %v1373_v0 = vadd.f32 %v1368_v63, %v1322_v34  ;;  %v1934_v2 = vpop.f32.mrb[19].mxu1 }
 0x4e0   : > { %1375 = vst [vmem:[#allocation3 + $0x8] sm:$0xff] %v1373_v0 }
 0x4e1 PF: > { %1935 = vmatprep.subr.bf16.mxu0 %v2059_v1  ;;  %s1701_s29 = sshll.u32 %s2048_s18, 7  ;;  %vm2064_vm2 = vmmov 0   ;;  %v1400_v12 = vld [vmem:[%s2409_s10] sm:$0xff]  ;;  %v1401_v14 = vld [vmem:[%s2409_s10 + $0x8] sm:$0xff] }
 0x4e2   : > { %s1380_s24 = sshra.s32 %s1701_s29, 3  ;;  %1951 = vmatprep.mubr.msk.bf16.mxu0 %vm2064_vm2, %v2059_v1 }
 0x4e3   : > { %s1702_s30 = sshll.u32 %s1380_s24, 2 }
 0x4e4   : > { %s1383_s27 = scalar_lea.vmem %s2407_s8, %s1702_s30 }
 0x4e5   : > { %v2012_v61 = vld [vmem:[%s1383_s27] sm:$0xff]   ;;  %v2013_v3 = vld [vmem:[%s1383_s27 + $0x8] sm:$0xff]   ;;  %v2014_v56 = vld [vmem:[%s1383_s27 + $0x10] sm:$0xff]  }
 0x4e6   : > { %1936 = vmatpush3.bf16.msra.mxu0 %v2012_v61  ;;  %v2015_v4 = vld [vmem:[%s1383_s27 + $0x18] sm:$0xff]   ;;  %v2016_v5 = vld [vmem:[%s1383_s27 + $0x20] sm:$0xff]   ;;  %v2017_v6 = vld [vmem:[%s1383_s27 + $0x28] sm:$0xff]  }
 0x4e7   : > { %1937 = vmatprep.subr.bf16.mxu0 %v2059_v1  ;;  %v2018_v7 = vld [vmem:[%s1383_s27 + $0x30] sm:$0xff]   ;;  %v2019_v8 = vld [vmem:[%s1383_s27 + $0x38] sm:$0xff]   ;;  %v1402_v9 = vld [vmem:[#allocation3] sm:$0xff] }
 0x4e8   : > { %v1403_v10 = vld [vmem:[#allocation3 + $0x8] sm:$0xff] }
 0x4e9   : > { %v1404_v11 = vpack.c.bf16 %v1403_v10, %v1402_v9 }
 0x4ea   : > { %1938 = vmatpush3.bf16.msra.mxu0 %v2013_v3 }
 0x4eb   : > { %1939 = vmatprep.subr.bf16.mxu0 %v2059_v1 }
 0x4ee   : > { %1940 = vmatpush3.bf16.msra.mxu0 %v2014_v56 }
 0x4ef   : > { %1941 = vmatprep.subr.bf16.mxu0 %v2059_v1 }
 0x4f2   : > { %1942 = vmatpush3.bf16.msra.mxu0 %v2015_v4 }
 0x4f3   : > { %1943 = vmatprep.subr.bf16.mxu0 %v2059_v1 }
 0x4f6   : > { %1944 = vmatpush3.bf16.msra.mxu0 %v2016_v5 }
 0x4f7   : > { %1945 = vmatprep.subr.bf16.mxu0 %v2059_v1 }
 0x4fa   : > { %1946 = vmatpush3.bf16.msra.mxu0 %v2017_v6 }
 0x4fb   : > { %1947 = vmatprep.subr.bf16.mxu0 %v2059_v1 }
 0x4fe   : > { %1948 = vmatpush3.bf16.msra.mxu0 %v2018_v7 }
 0x4ff   : > { %1949 = vmatprep.subr.bf16.mxu0 %v2059_v1 }
 0x502   : > { %1950 = vmatpush3.bf16.msra.mxu0 %v2019_v8 }
 0x505   : > { %1952 = vmatmul.mubr.bf16.vlgmr.msra.gmra.mrb[0].mxu0 %v1404_v11 }
 0x5d8   : > { %v1487_v13 = vpop.f32.mrb[0].mxu0 }
 0x5d9   : > { %v1494_v15 = vadd.f32 %v1487_v13, %v1400_v12  ;;  %v1953_v16 = vpop.f32.mrb[1].mxu0 }
 0x5da   : > { %v1490_v17 = vpop.f32.mrb[2].mxu0 }
 0x5db   : > { %1496 = vst [vmem:[%s2409_s10] sm:$0xff] %v1494_v15  ;;  %v1495_v1 = vadd.f32 %v1490_v17, %v1401_v14  ;;  %v1954_v18 = vpop.f32.mrb[3].mxu0 }
 0x5dd   : > { %1497 = vst [vmem:[%s2409_s10 + $0x8] sm:$0xff] %v1495_v1 }
 0x5de PF: > { %s26_s20 = sadd.s32 1, %s2056_s20   ;;  %s2411_s25 = sld [smem:[#allocation7_spill]] }
 0x5df   : > { %p23_p4 = scmp.ge.s32.totalorder %s26_s20, 5   ;;  %s2412_s18 = smov %s2052_s19 }
 0x5e1   :  { %25 = sbr.rel (!%p23_p4) target bundleno = 17 (0x11), region = 125 }
 0x5e4   : > { %s2413_s19 = smov %s2411_s25 }

</bundles_post_ra>
